<compile_context>
chip_gen: v6e
topology: v6e:2x2x1
jax: 0.10.0
libtpu: 0.0.40
codegen_flags: <defaults>
</compile_context>

<pallas_src>
import functools

import jax
import jax.numpy as jnp
from jax import lax
from jax.experimental import pallas as pl
from jax.experimental.pallas import tpu as pltpu


def _round_up(x, m):
    return ((x + m - 1) // m) * m


def _cout_tiling(cout):
    """Padded Cout and Cout tile width (lane-dense; 256 fills the v6e/v7x MXU)."""
    if cout <= 128:
        return 128, 128
    return _round_up(cout, 256), 256


def _compiler_params(block_bytes, semantics):
    # Budget for double-buffered blocks plus margin; harmless when below default.
    limit = int(min(max(2 * block_bytes + (8 << 20), 32 << 20), 126 << 20))
    return pltpu.CompilerParams(dimension_semantics=semantics,
                                vmem_limit_bytes=limit)


# ---------------------------------------------------------------------------
# Fused (stride == 1) path: implicit-im2col conv + bias + ReLU, M/Cout tiled.
# ---------------------------------------------------------------------------
def _fused_conv_kernel(x_ref, w_ref, b_ref, o_ref, *, taps, tm):
    # x_ref: (1, L, cin_p)        flattened padded image (compute dtype)
    # w_ref: (KH*KW, cin_p, TN)   BN-scale-folded weight tile (compute dtype)
    # b_ref: (1, TN)              folded BN bias (f32)
    # o_ref: (1, TM, TN)          extended NHWC output tile
    tn = o_ref.shape[-1]
    base = pl.multiple_of(pl.program_id(2) * tm, 8)      # m-tile start (sublane aligned)
    acc = jnp.broadcast_to(b_ref[...], (tm, tn))         # bias-initialized f32 acc
    for t, off in enumerate(taps):                       # static unrolled KH*KW taps
        lhs = x_ref[0, pl.ds(base + off, tm), :]         # (TM, cin_p)
        acc = acc + jnp.dot(lhs, w_ref[t], preferred_element_type=jnp.float32)
    o_ref[0] = jnp.maximum(acc, 0.0).astype(o_ref.dtype)


def _fused_stride1(x_nhwc, weight, scale, bias, *, pad, dilation,
                   compute_dtype, tm_target):
    N, H, W, Cin = x_nhwc.shape
    Cout, _, KH, KW = weight.shape
    dil = dilation
    eKH = (KH - 1) * dil + 1
    eKW = (KW - 1) * dil + 1
    Hp, Wp = H + 2 * pad, W + 2 * pad
    OH, OW = Hp - eKH + 1, Wp - eKW + 1

    cout_p, tn = _cout_tiling(Cout)
    cd_size = jnp.dtype(compute_dtype).itemsize
    cin_p = _round_up(Cin, (8 * 4) // cd_size)           # sublane mult: 8 f32 / 16 bf16

    # Row pitch padded to a sublane multiple so the kh tap offsets are 8-aligned.
    wp_p = _round_up(Wp, 8)
    m_ext = OH * wp_p                                    # extended rows per image

    # M tile: multiple of 8, snapped to a multiple of the row pitch when possible.
    tm = min(_round_up(tm_target, 8), _round_up(m_ext, 8))
    if tm >= wp_p:
        tm = (tm // wp_p) * wp_p
    m_ext_p = _round_up(m_ext, tm)

    taps = tuple(kh * dil * wp_p + kw * dil
                 for kh in range(KH) for kw in range(KW))
    max_tap = taps[-1]

    # One pad covers: spatial halo, width pad to wp_p, channel pad to cin_p and
    # enough extra zero rows that every shifted slice of every m-tile is in
    # bounds (no runtime OOB check on VMEM refs!).
    need = m_ext_p + max_tap
    extra_h = max(0, -(-(need - Hp * wp_p) // wp_p))
    L = (Hp + extra_h) * wp_p
    xp = jnp.pad(x_nhwc.astype(compute_dtype),
                 ((0, 0), (pad, pad + extra_h), (pad, pad + (wp_p - Wp)),
                  (0, cin_p - Cin)))
    x_flat = xp.reshape(N, L, cin_p)

    # (Cout, Cin, KH, KW) -> (KH*KW, cin_p, cout_p); BN scale folded in f32, cast last.
    w = (jnp.transpose(weight, (2, 3, 1, 0)).astype(jnp.float32)
         * scale[None, None, None, :])
    w = jnp.pad(w, ((0, 0), (0, 0), (0, cin_p - Cin), (0, cout_p - Cout)))
    w = w.reshape(KH * KW, cin_p, cout_p).astype(compute_dtype)
    bias_p = jnp.pad(bias, (0, cout_p - Cout)).reshape(1, cout_p).astype(jnp.float32)

    out_size = jnp.dtype(x_nhwc.dtype).itemsize
    block_bytes = (L * cin_p * cd_size + KH * KW * cin_p * tn * cd_size
                   + tn * 4 + tm * tn * out_size + tm * tn * 4)
    cost = pl.CostEstimate(
        flops=int(2 * N * OH * OW * KH * KW * Cin * Cout),
        transcendentals=0,
        bytes_accessed=int(x_flat.size * cd_size + w.size * cd_size
                           + N * m_ext_p * cout_p * out_size))

    kernel = functools.partial(_fused_conv_kernel, taps=taps, tm=tm)
    out = pl.pallas_call(
        kernel,
        out_shape=jax.ShapeDtypeStruct((N, m_ext_p, cout_p), x_nhwc.dtype),
        grid_spec=pltpu.PrefetchScalarGridSpec(
            num_scalar_prefetch=0,
            # m innermost: image resident across (j, i); weights across i.
            grid=(N, cout_p // tn, m_ext_p // tm),
            in_specs=[
                pl.BlockSpec((1, L, cin_p), lambda n, j, i: (n, 0, 0)),
                pl.BlockSpec((KH * KW, cin_p, tn), lambda n, j, i: (0, 0, j)),
                pl.BlockSpec((1, tn), lambda n, j, i: (0, j)),
            ],
            out_specs=pl.BlockSpec((1, tm, tn), lambda n, j, i: (n, i, j)),
        ),
        compiler_params=_compiler_params(
            block_bytes, ("parallel", "parallel", "parallel")),
        cost_estimate=cost,
    )(x_flat, w, bias_p)

    # Drop padded rows, garbage (extended-width) columns and padded channels.
    out = out[:, :m_ext].reshape(N, OH, wp_p, cout_p)[:, :, :OW, :Cout]
    return out                                           # (N, OH, OW, Cout)


# ---------------------------------------------------------------------------
# General fallback (stride > 1 or small Cin): wrapper-side im2col + blocked
# matmul (M x Cout x K grid, K innermost with an f32 scratch accumulator).
# ---------------------------------------------------------------------------
def _matmul_bias_relu_kernel(p_ref, w_ref, b_ref, o_ref, acc_ref):
    k = pl.program_id(2)

    @pl.when(k == 0)
    def _():
        acc_ref[...] = jnp.broadcast_to(b_ref[...], acc_ref.shape)

    acc_ref[...] += jnp.dot(p_ref[...], w_ref[...],
                            preferred_element_type=jnp.float32)

    @pl.when(k == pl.num_programs(2) - 1)
    def _():
        o_ref[...] = jnp.maximum(acc_ref[...], 0.0).astype(o_ref.dtype)


def _im2col_path(x_nhwc, weight, scale, bias, *, stride, pad, dilation,
                 compute_dtype, tm_target, tk_target):
    N, H, W, Cin = x_nhwc.shape
    Cout, _, KH, KW = weight.shape
    dil = dilation
    eKH = (KH - 1) * dil + 1
    eKW = (KW - 1) * dil + 1
    OH = (H + 2 * pad - eKH) // stride + 1
    OW = (W + 2 * pad - eKW) // stride + 1

    cout_p, tn = _cout_tiling(Cout)
    cd_size = jnp.dtype(compute_dtype).itemsize
    k_align = (8 * 4) // cd_size
    tk_target = _round_up(tk_target, 128)

    # Wrapper-side im2col (patch matrix in HBM; see module-level TODO).
    xp = jnp.pad(x_nhwc.astype(compute_dtype),
                 ((0, 0), (pad, pad), (pad, pad), (0, 0)))
    patches = []
    for kh in range(KH):
        for kw in range(KW):
            h0, w0 = kh * dil, kw * dil
            patches.append(xp[:, h0:h0 + (OH - 1) * stride + 1:stride,
                              w0:w0 + (OW - 1) * stride + 1:stride, :])
    patches = jnp.concatenate(patches, axis=-1)          # (N, OH, OW, KH*KW*Cin)

    K = KH * KW * Cin
    M = N * OH * OW
    patches = patches.reshape(M, K)

    if _round_up(K, k_align) > tk_target:
        tk = tk_target                                   # multiple of 128
        K_p = _round_up(K, tk)
    else:
        K_p = _round_up(K, k_align)
        tk = K_p                                         # single K step (full dim)

    tm = min(_round_up(tm_target, 8), _round_up(M, 8))
    M_p = _round_up(M, tm)
    patches = jnp.pad(patches, ((0, M_p - M), (0, K_p - K)))

    w_mat = (jnp.transpose(weight, (2, 3, 1, 0)).reshape(K, Cout)
             .astype(jnp.float32) * scale[None, :])
    w_mat = jnp.pad(w_mat, ((0, K_p - K), (0, cout_p - Cout))).astype(compute_dtype)
    bias_p = jnp.pad(bias, (0, cout_p - Cout)).reshape(1, cout_p).astype(jnp.float32)

    out_size = jnp.dtype(x_nhwc.dtype).itemsize
    block_bytes = (tm * tk * cd_size + tk * tn * cd_size + tn * 4
                   + tm * tn * out_size + tm * tn * 4)
    cost = pl.CostEstimate(
        flops=int(2 * M * K * Cout),
        transcendentals=0,
        bytes_accessed=int(M_p * K_p * cd_size + K_p * cout_p * cd_size
                           + M_p * cout_p * out_size))

    out = pl.pallas_call(
        _matmul_bias_relu_kernel,
        out_shape=jax.ShapeDtypeStruct((M_p, cout_p), x_nhwc.dtype),
        grid_spec=pltpu.PrefetchScalarGridSpec(
            num_scalar_prefetch=0,
            grid=(M_p // tm, cout_p // tn, K_p // tk),   # K innermost (reduction)
            in_specs=[
                pl.BlockSpec((tm, tk), lambda i, j, k: (i, k)),
                pl.BlockSpec((tk, tn), lambda i, j, k: (k, j)),
                pl.BlockSpec((1, tn), lambda i, j, k: (0, j)),
            ],
            out_specs=pl.BlockSpec((tm, tn), lambda i, j, k: (i, j)),
            scratch_shapes=[pltpu.VMEM((tm, tn), jnp.float32)],
        ),
        compiler_params=_compiler_params(
            block_bytes, ("parallel", "parallel", "arbitrary")),
        cost_estimate=cost,
    )(patches, w_mat, bias_p)

    return out[:M, :Cout].reshape(N, OH, OW, Cout)


# ---------------------------------------------------------------------------
# Public wrapper: Conv2d + BatchNorm2d(eval) + ReLU, NCHW in/out (PyTorch parity).
# ---------------------------------------------------------------------------
def conv2d_bn_relu_pallas(x_nchw, weight, gamma=None, beta=None,
                          running_mean=None, running_var=None, *,
                          conv_bias=None, if_bn=True, stride=1, pad=1,
                          dilation=1, eps=1e-5, compute_dtype=jnp.bfloat16,
                          path=None, tm=512, tk=512, out_format="NCHW"):
    """x_nchw: (N, Cin, H, W); weight: (Cout, Cin, KH, KW) (PyTorch layout).

    compute_dtype=bfloat16 (default, MXU-native) or float32 (bit-accurate).
    path: None (auto) | "fused" | "im2col".
    out_format="NHWC" skips the final transpose when chaining layers.
    """
    Cout = weight.shape[0]
    if if_bn:
        scale = (gamma / jnp.sqrt(running_var + eps)).astype(jnp.float32)  # (Cout,)
        bias = (beta - running_mean * scale).astype(jnp.float32)           # (Cout,)
    else:
        scale = jnp.ones((Cout,), jnp.float32)
        bias = (jnp.zeros((Cout,), jnp.float32) if conv_bias is None
                else conv_bias.astype(jnp.float32))

    x_nhwc = jnp.transpose(x_nchw, (0, 2, 3, 1))

    cin_p = _round_up(x_nchw.shape[1],
                      (8 * 4) // jnp.dtype(compute_dtype).itemsize)
    # Small-Cin stem convs get a deeper MXU contraction from im2col (K=KH*KW*Cin).
    use_fused = (stride == 1) and cin_p >= 32
    if path == "fused":
        use_fused = stride == 1
    elif path == "im2col":
        use_fused = False

    if use_fused:
        out_nhwc = _fused_stride1(x_nhwc, weight, scale, bias, pad=pad,
                                  dilation=dilation, compute_dtype=compute_dtype,
                                  tm_target=tm)
    else:
        out_nhwc = _im2col_path(x_nhwc, weight, scale, bias, stride=stride,
                                pad=pad, dilation=dilation,
                                compute_dtype=compute_dtype,
                                tm_target=tm, tk_target=tk)

    if out_format == "NHWC":
        return out_nhwc
    return jnp.transpose(out_nhwc, (0, 3, 1, 2))         # PyTorch NCHW parity


def _reference(x_nchw, weight, gamma, beta, running_mean, running_var,
               *, stride=1, pad=1, dilation=1, eps=1e-5):
    y = lax.conv_general_dilated(
        x_nchw, weight,
        window_strides=(stride, stride),
        padding=((pad, pad), (pad, pad)),
        rhs_dilation=(dilation, dilation),
        dimension_numbers=("NCHW", "OIHW", "NCHW"))
    scale = (gamma / jnp.sqrt(running_var + eps)).reshape(1, -1, 1, 1)
    bias = (beta - running_mean * gamma / jnp.sqrt(running_var + eps)).reshape(1, -1, 1, 1)
    return jnp.maximum(y * scale + bias, 0.0)


if __name__ == "__main__":
    root = jax.random.PRNGKey(0)
    ks = jax.random.split(root, 16)

    def make_params(cin, cout, k, keys):
        k2, k3, k4, k5, k6 = keys
        weight = jax.random.normal(k2, (cout, cin, k, k), dtype=jnp.float32) * 0.1
        gamma = 1.0 + 0.1 * jax.random.normal(k3, (cout,), dtype=jnp.float32)
        beta = 0.1 * jax.random.normal(k4, (cout,), dtype=jnp.float32)
        mean = 0.1 * jax.random.normal(k5, (cout,), dtype=jnp.float32)
        var = jnp.abs(1.0 + 0.1 * jax.random.normal(k6, (cout,), dtype=jnp.float32))
        return weight, gamma, beta, mean, var

    def check(x, params, *, stride, pad, dilation=1, compute_dtype, path=None,
              tm=512, atol=1e-4, rtol=1e-4):
        weight, gamma, beta, mean, var = params
        fn = jax.jit(functools.partial(
            conv2d_bn_relu_pallas, stride=stride, pad=pad, dilation=dilation,
            compute_dtype=compute_dtype, path=path, tm=tm))
        out = jax.block_until_ready(fn(x, weight, gamma, beta, mean, var))
        ref = _reference(x, weight, gamma, beta, mean, var,
                         stride=stride, pad=pad, dilation=dilation)
        assert out.shape == ref.shape, (out.shape, ref.shape)
        err = jnp.max(jnp.abs(out - ref))
        assert jnp.allclose(out, ref, atol=atol, rtol=rtol), f"max abs err {err}"

    # Module config: Conv2D_BN_activa(in_channels=4, out_channels=8,
    #                                 kernel_size=3, stride=1, pad=1)
    x0 = jax.random.normal(ks[0], (2, 4, 16, 16), dtype=jnp.float32)
    p0 = make_params(4, 8, 3, ks[1:6])

    # Default path: bf16 MXU operands, auto dispatch (small Cin -> im2col).
    check(x0, p0, stride=1, pad=1, compute_dtype=jnp.bfloat16,
          atol=5e-2, rtol=5e-2)
    # f32 accuracy fallback, both code paths, tight tolerance.
    check(x0, p0, stride=1, pad=1, compute_dtype=jnp.float32, path="im2col")
    check(x0, p0, stride=1, pad=1, compute_dtype=jnp.float32, path="fused")

    # Fused path with multiple M tiles and 256-wide Cout tiles (auto dispatch).
    x1 = jax.random.normal(ks[6], (1, 32, 12, 12), dtype=jnp.float32)
    p1 = make_params(32, 320, 3, jax.random.split(ks[7], 5))
    check(x1, p1, stride=1, pad=1, compute_dtype=jnp.float32, tm=64)

    # Stride-2 im2col path with K blocking (K=576 -> 2 K-steps) and Cout tiles.
    x2 = jax.random.normal(ks[8], (1, 64, 16, 16), dtype=jnp.float32)
    p2 = make_params(64, 320, 3, jax.random.split(ks[9], 5))
    check(x2, p2, stride=2, pad=1, compute_dtype=jnp.float32)

    print("KERNEL_OK")
</pallas_src>

<mosaic_0001>
module attributes {stable_mosaic.version = 11 : i64} {
  func.func @_matmul_bias_relu_kernel(%arg0: i32, %arg1: i32, %arg2: i32, %arg3: memref<512x48xbf16, #tpu.memory_space<vmem>>, %arg4: memref<48x128xbf16, #tpu.memory_space<vmem>>, %arg5: memref<1x128xf32, #tpu.memory_space<vmem>>, %arg6: memref<512x128xf32, #tpu.memory_space<vmem>>, %arg7: memref<512x128xf32, #tpu.memory_space<vmem>>) attributes {dimension_semantics = [#tpu.dimension_semantics<parallel>, #tpu.dimension_semantics<parallel>, #tpu.dimension_semantics<arbitrary>], iteration_bounds = array<i64: 1, 1, 1>, scalar_prefetch = 0 : i64, scratch_operands = 1 : i64, tpu.core_type = #tpu.core_type<tc>, window_params = [{transform_indices = @transform_0, window_bounds = array<i64: 512, 48>}, {transform_indices = @transform_1, window_bounds = array<i64: 48, 128>}, {transform_indices = @transform_2, window_bounds = array<i64: 1, 128>}, {transform_indices = @transform_3, window_bounds = array<i64: 512, 128>}]} {
    %c0_i32 = arith.constant 0 : i32
    %0 = arith.cmpi eq, %arg2, %c0_i32 : i32
    %1 = arith.extui %0 : i1 to i32
    %c0_i32_0 = arith.constant 0 : i32
    %2 = arith.cmpi ne, %1, %c0_i32_0 : i32
    scf.if %2 {
      %c0_10 = arith.constant 0 : index
      %c0_11 = arith.constant 0 : index
      %12 = vector.load %arg5[%c0_10, %c0_11] : memref<1x128xf32, #tpu.memory_space<vmem>>, vector<1x128xf32>
      %13 = vector.shape_cast %12 : vector<1x128xf32> to vector<1x128xf32>
      %14 = vector.broadcast %13 : vector<1x128xf32> to vector<512x128xf32>
      %c0_12 = arith.constant 0 : index
      %c0_13 = arith.constant 0 : index
      %15 = vector.load %arg7[%c0_12, %c0_13] : memref<512x128xf32, #tpu.memory_space<vmem>>, vector<512x128xf32>
      tpu.vector_store %arg7[%c0_12, %c0_13], %14 {strides = array<i32>} : memref<512x128xf32, #tpu.memory_space<vmem>>, vector<512x128xf32>,
    } else {
    }
    %c0 = arith.constant 0 : index
    %c0_1 = arith.constant 0 : index
    %3 = vector.load %arg7[%c0, %c0_1] : memref<512x128xf32, #tpu.memory_space<vmem>>, vector<512x128xf32>
    %c0_2 = arith.constant 0 : index
    %c0_3 = arith.constant 0 : index
    %4 = vector.load %arg3[%c0_2, %c0_3] : memref<512x48xbf16, #tpu.memory_space<vmem>>, vector<512x48xbf16>
    %c0_4 = arith.constant 0 : index
    %c0_5 = arith.constant 0 : index
    %5 = vector.load %arg4[%c0_4, %c0_5] : memref<48x128xbf16, #tpu.memory_space<vmem>>, vector<48x128xbf16>
    %cst = arith.constant dense<0.000000e+00> : vector<512x128xf32>
    %6 = tpu.matmul %4, %5, %cst {dimension_numbers = #tpu.dot_dimension_numbers<[1], [0], [0], [1], [0, 0, 1, 1], [], []>} : vector<512x48xbf16>, vector<48x128xbf16>, vector<512x128xf32> -> vector<512x128xf32>
    %7 = arith.addf %3, %6 : vector<512x128xf32>
    %c0_6 = arith.constant 0 : index
    %c0_7 = arith.constant 0 : index
    %8 = vector.load %arg7[%c0_6, %c0_7] : memref<512x128xf32, #tpu.memory_space<vmem>>, vector<512x128xf32>
    tpu.vector_store %arg7[%c0_6, %c0_7], %7 {strides = array<i32>} : memref<512x128xf32, #tpu.memory_space<vmem>>, vector<512x128xf32>,
    %c0_i32_8 = arith.constant 0 : i32
    %9 = arith.cmpi eq, %arg2, %c0_i32_8 : i32
    %10 = arith.extui %9 : i1 to i32
    %c0_i32_9 = arith.constant 0 : i32
    %11 = arith.cmpi ne, %10, %c0_i32_9 : i32
    scf.if %11 {
      %c0_10 = arith.constant 0 : index
      %c0_11 = arith.constant 0 : index
      %12 = vector.load %arg7[%c0_10, %c0_11] : memref<512x128xf32, #tpu.memory_space<vmem>>, vector<512x128xf32>
      %cst_12 = arith.constant 0.000000e+00 : f32
      %13 = vector.broadcast %cst_12 : f32 to vector<512x128xf32>
      %14 = arith.maximumf %12, %13 : vector<512x128xf32>
      %c0_13 = arith.constant 0 : index
      %c0_14 = arith.constant 0 : index
      %15 = vector.load %arg6[%c0_13, %c0_14] : memref<512x128xf32, #tpu.memory_space<vmem>>, vector<512x128xf32>
      tpu.vector_store %arg6[%c0_13, %c0_14], %14 {strides = array<i32>} : memref<512x128xf32, #tpu.memory_space<vmem>>, vector<512x128xf32>,
    } else {
    }
    return
  }
  func.func @transform_0(%arg0: i32, %arg1: i32, %arg2: i32) -> (i32, i32) {
    %c0_i32 = arith.constant 0 : i32
    return %arg0, %arg2 : i32, i32
  }
  func.func @transform_1(%arg0: i32, %arg1: i32, %arg2: i32) -> (i32, i32) {
    %c0_i32 = arith.constant 0 : i32
    return %arg2, %arg1 : i32, i32
  }
  func.func @transform_2(%arg0: i32, %arg1: i32, %arg2: i32) -> (i32, i32) {
    %c0_i32 = arith.constant 0 : i32
    %c0_i32_0 = arith.constant 0 : i32
    return %c0_i32, %arg1 : i32, i32
  }
  func.func @transform_3(%arg0: i32, %arg1: i32, %arg2: i32) -> (i32, i32) {
    %c0_i32 = arith.constant 0 : i32
    return %arg0, %arg1 : i32, i32
  }
}

</mosaic_0001>

<bundles_post_ra>
// kernel: conv2d_bn_relu_pallas.1
= control target key start
LH: loop header
LB: loop body
LE: loop exit
PB: predicated region body
PF: predicated region fallthrough
CT: control target
= control target key end

     0   :  { %vm402_vm0 = vcmask 392192   ;;  %s1747_s1 = inlined_call_operand.vmem [shape: bf16[48,128], index: 1, kind: input, shape index: {}]   ;;  %s1748_s0 = inlined_call_operand.vmem [shape: bf16[512,48], index: 0, kind: input, shape index: {}]   ;;  %s1749_s2 = inlined_call_operand.vmem [shape: f32[1,128], index: 2, kind: input, shape index: {}]   ;;  %s1750_s3 = inlined_call_operand.vmem [shape: f32[512,128], index: 3, kind: output, shape index: {}]  }
   0x1   :  { %v1294_v0 = vld [vmem:[%s1747_s1 + $0x10] sm:$0xff]   ;;  %v1295_v1 = vld [vmem:[%s1747_s1 + $0x8] sm:$0xff]   ;;  %v1296_v2 = vld [vmem:[%s1747_s1] sm:$0xff]  }
   0x2   :  { %1218 = vmatprep.subr.bf16.mxu0 %v1294_v0  ;;  %1288 = vmatprep.subr.bf16.mxu1 %v1294_v0  ;;  %v1297_v3 = vld [vmem:[%s1748_s0] sm:$0xff]   ;;  %v1299_v5 = vld [vmem:[%s1748_s0 + $0x8] sm:$0xff]   ;;  %v1301_v7 = vld [vmem:[%s1748_s0 + $0x10] sm:$0xff]  }
   0x3   :  { %1219 = vmatpush3.bf16.msra.mxu0 %v1294_v0  ;;  %1291 = vmatpush3.bf16.msra.mxu1 %v1294_v0  ;;  %v1298_v4 = vld [vmem:[%s1748_s0 + $0x80] sm:$0xff]   ;;  %v1300_v6 = vld [vmem:[%s1748_s0 + $0x88] sm:$0xff]   ;;  %v1302_v8 = vld [vmem:[%s1748_s0 + $0x90] sm:$0xff]  }
   0x4   :  { %1220 = vmatprep.subr.bf16.mxu0 %v1295_v1  ;;  %1289 = vmatprep.subr.bf16.mxu1 %v1295_v1  ;;  %v1303_v9 = vld [vmem:[%s1748_s0 + $0x18] sm:$0xff]   ;;  %v1305_v11 = vld [vmem:[%s1748_s0 + $0x20] sm:$0xff]   ;;  %v1307_v13 = vld [vmem:[%s1748_s0 + $0x28] sm:$0xff]  }
   0x5   :  { %1224 = vmatprep.mubr.msk.bf16.mxu0 %vm402_vm0, %v1297_v3  ;;  %1256 = vmatprep.mubr.msk.bf16.mxu1 %vm402_vm0, %v1298_v4  ;;  %v1304_v10 = vld [vmem:[%s1748_s0 + $0x98] sm:$0xff]   ;;  %v1306_v12 = vld [vmem:[%s1748_s0 + $0xa0] sm:$0xff]   ;;  %v1308_v14 = vld [vmem:[%s1748_s0 + $0xa8] sm:$0xff]  }
   0x6   :  { %v1309_v15 = vld [vmem:[%s1748_s0 + $0x30] sm:$0xff]   ;;  %v1311_v17 = vld [vmem:[%s1748_s0 + $0x38] sm:$0xff]   ;;  %v1313_v19 = vld [vmem:[%s1748_s0 + $0x40] sm:$0xff]  }
   0x7   :  { %1221 = vmatpush3.bf16.msra.mxu0 %v1295_v1  ;;  %1292 = vmatpush3.bf16.msra.mxu1 %v1295_v1  ;;  %v1310_v16 = vld [vmem:[%s1748_s0 + $0xb0] sm:$0xff]   ;;  %v1312_v18 = vld [vmem:[%s1748_s0 + $0xb8] sm:$0xff]   ;;  %v1314_v20 = vld [vmem:[%s1748_s0 + $0xc0] sm:$0xff]  }
   0x8   :  { %1222 = vmatprep.subr.bf16.mxu0 %v1296_v2  ;;  %1290 = vmatprep.subr.bf16.mxu1 %v1296_v2  ;;  %v1315_v21 = vld [vmem:[%s1748_s0 + $0x48] sm:$0xff]   ;;  %v1317_v23 = vld [vmem:[%s1748_s0 + $0x50] sm:$0xff]   ;;  %v1319_v25 = vld [vmem:[%s1748_s0 + $0x58] sm:$0xff]  }
   0x9   :  { %v1316_v22 = vld [vmem:[%s1748_s0 + $0xc8] sm:$0xff]   ;;  %v1318_v24 = vld [vmem:[%s1748_s0 + $0xd0] sm:$0xff]   ;;  %v1320_v26 = vld [vmem:[%s1748_s0 + $0xd8] sm:$0xff]  }
   0xa   :  { %v1321_v27 = vld [vmem:[%s1748_s0 + $0x60] sm:$0xff]   ;;  %v1323_v29 = vld [vmem:[%s1748_s0 + $0x68] sm:$0xff]   ;;  %v1325_v31 = vld [vmem:[%s1748_s0 + $0x70] sm:$0xff]  }
   0xb   :  { %1223 = vmatpush3.bf16.msra.mxu0 %v1296_v2  ;;  %1293 = vmatpush3.bf16.msra.mxu1 %v1296_v2  ;;  %v1322_v28 = vld [vmem:[%s1748_s0 + $0xe0] sm:$0xff]   ;;  %v1324_v30 = vld [vmem:[%s1748_s0 + $0xe8] sm:$0xff]   ;;  %v1326_v32 = vld [vmem:[%s1748_s0 + $0xf0] sm:$0xff]  }
   0xc   :  { %v1327_v33 = vld [vmem:[%s1748_s0 + $0x78] sm:$0xff]   ;;  %v1489_v35 = vld [vmem:[%s1749_s2] ss:$0 sm:$0xff] }
   0xd   :  { %v1328_v34 = vld [vmem:[%s1748_s0 + $0xf8] sm:$0xff]  }
   0xe   :  { %1225 = vmatmul.mubr.msk.bf16.vlgmr.msra.gmra.mxu0 %vm402_vm0, %v1299_v5  ;;  %1257 = vmatmul.mubr.msk.bf16.vlgmr.msra.gmra.mxu1 %vm402_vm0, %v1300_v6 }
   0xf   :  { %1228 = vmatprep.mubr.msk.bf16.mxu0 %vm402_vm0, %v1301_v7  ;;  %1260 = vmatprep.mubr.msk.bf16.mxu1 %vm402_vm0, %v1302_v8 }
  0x16   :  { %1229 = vmatmul.mubr.msk.bf16.gmra.mxu0 %vm402_vm0, %v1303_v9  ;;  %1261 = vmatmul.mubr.msk.bf16.gmra.mxu1 %vm402_vm0, %v1304_v10 }
  0x17   :  { %1232 = vmatprep.mubr.msk.bf16.mxu0 %vm402_vm0, %v1305_v11  ;;  %1264 = vmatprep.mubr.msk.bf16.mxu1 %vm402_vm0, %v1306_v12 }
  0x1e   :  { %1233 = vmatmul.mubr.msk.bf16.gmra.mxu0 %vm402_vm0, %v1307_v13  ;;  %1265 = vmatmul.mubr.msk.bf16.gmra.mxu1 %vm402_vm0, %v1308_v14 }
  0x1f   :  { %1236 = vmatprep.mubr.msk.bf16.mxu0 %vm402_vm0, %v1309_v15  ;;  %1268 = vmatprep.mubr.msk.bf16.mxu1 %vm402_vm0, %v1310_v16 }
  0x26   :  { %1237 = vmatmul.mubr.msk.bf16.gmra.mxu0 %vm402_vm0, %v1311_v17  ;;  %1269 = vmatmul.mubr.msk.bf16.gmra.mxu1 %vm402_vm0, %v1312_v18 }
  0x27   :  { %1240 = vmatprep.mubr.msk.bf16.mxu0 %vm402_vm0, %v1313_v19  ;;  %1272 = vmatprep.mubr.msk.bf16.mxu1 %vm402_vm0, %v1314_v20 }
  0x2e   :  { %1241 = vmatmul.mubr.msk.bf16.gmra.mxu0 %vm402_vm0, %v1315_v21  ;;  %1273 = vmatmul.mubr.msk.bf16.gmra.mxu1 %vm402_vm0, %v1316_v22 }
  0x2f   :  { %1244 = vmatprep.mubr.msk.bf16.mxu0 %vm402_vm0, %v1317_v23  ;;  %1276 = vmatprep.mubr.msk.bf16.mxu1 %vm402_vm0, %v1318_v24 }
  0x36   :  { %1245 = vmatmul.mubr.msk.bf16.gmra.mxu0 %vm402_vm0, %v1319_v25  ;;  %1277 = vmatmul.mubr.msk.bf16.gmra.mxu1 %vm402_vm0, %v1320_v26 }
  0x37   :  { %1248 = vmatprep.mubr.msk.bf16.mxu0 %vm402_vm0, %v1321_v27  ;;  %1280 = vmatprep.mubr.msk.bf16.mxu1 %vm402_vm0, %v1322_v28 }
  0x3e   :  { %1249 = vmatmul.mubr.msk.bf16.gmra.mxu0 %vm402_vm0, %v1323_v29  ;;  %1281 = vmatmul.mubr.msk.bf16.gmra.mxu1 %vm402_vm0, %v1324_v30 }
  0x3f   :  { %1252 = vmatprep.mubr.msk.bf16.mxu0 %vm402_vm0, %v1325_v31  ;;  %1284 = vmatprep.mubr.msk.bf16.mxu1 %vm402_vm0, %v1326_v32 }
  0x46   :  { %1253 = vmatmul.mubr.msk.bf16.gmra.mxu0 %vm402_vm0, %v1327_v33  ;;  %1285 = vmatmul.mubr.msk.bf16.gmra.mxu1 %vm402_vm0, %v1328_v34 }
  0xce   :  { %v1226_v36 = vpop.f32.mrf.mxu0  ;;  %v1258_v37 = vpop.f32.mrf.mxu1 }
  0xcf   :  { %v790_v38 = vadd.f32 %v1226_v36, %v1489_v35  ;;  %v822_v39 = vadd.f32 %v1258_v37, %v1489_v35 }
  0xd0   :  { %v533_v40 = vpop.f32.mrf.mxu0  ;;  %v661_v41 = vpop.f32.mrf.mxu1 }
  0xd1   :  { %v985_v42 = vmax.f32 %v790_v38, 0.0  ;;  %v1017_v43 = vmax.f32 %v822_v39, 0.0  ;;  %v788_v44 = vadd.f32 %v1489_v35, %v533_v40  ;;  %v820_v45 = vadd.f32 %v1489_v35, %v661_v41 }
  0xd2   :  { %v1227_v46 = vpop.f32.mrf.mxu0  ;;  %v1259_v47 = vpop.f32.mrf.mxu1 }
  0xd3   :  { %1049 = vst [vmem:[%s1750_s3 + $0x10] sm:$0xff] %v985_v42  ;;  %1081 = vst [vmem:[%s1750_s3 + $0x110] sm:$0xff] %v1017_v43  ;;  %v983_v48 = vmax.f32 %v788_v44, 0.0  ;;  %v1015_v49 = vmax.f32 %v820_v45, 0.0  ;;  %v791_v50 = vadd.f32 %v1227_v46, %v1489_v35  ;;  %v823_v51 = vadd.f32 %v1259_v47, %v1489_v35 }
  0xd4   :  { %v536_v52 = vpop.f32.mrf.mxu0  ;;  %v664_v53 = vpop.f32.mrf.mxu1 }
  0xd5   :  { %1047 = vst [vmem:[%s1750_s3] sm:$0xff] %v983_v48  ;;  %1079 = vst [vmem:[%s1750_s3 + $0x100] sm:$0xff] %v1015_v49  ;;  %v986_v54 = vmax.f32 %v791_v50, 0.0  ;;  %v1018_v55 = vmax.f32 %v823_v51, 0.0  ;;  %v789_v56 = vadd.f32 %v1489_v35, %v536_v52  ;;  %v821_v57 = vadd.f32 %v1489_v35, %v664_v53 }
  0xd6   :  { %v1230_v58 = vpop.f32.mrf.mxu0  ;;  %v1262_v59 = vpop.f32.mrf.mxu1 }
  0xd7   :  { %1050 = vst [vmem:[%s1750_s3 + $0x18] sm:$0xff] %v986_v54  ;;  %1082 = vst [vmem:[%s1750_s3 + $0x118] sm:$0xff] %v1018_v55  ;;  %v984_v60 = vmax.f32 %v789_v56, 0.0  ;;  %v1016_v61 = vmax.f32 %v821_v57, 0.0  ;;  %v794_v62 = vadd.f32 %v1230_v58, %v1489_v35  ;;  %v826_v63 = vadd.f32 %v1262_v59, %v1489_v35 }
  0xd8   :  { %v549_v0 = vpop.f32.mrf.mxu0  ;;  %v677_v1 = vpop.f32.mrf.mxu1 }
  0xd9   :  { %1048 = vst [vmem:[%s1750_s3 + $0x8] sm:$0xff] %v984_v60  ;;  %1080 = vst [vmem:[%s1750_s3 + $0x108] sm:$0xff] %v1016_v61  ;;  %v989_v2 = vmax.f32 %v794_v62, 0.0  ;;  %v1021_v3 = vmax.f32 %v826_v63, 0.0  ;;  %v792_v4 = vadd.f32 %v1489_v35, %v549_v0  ;;  %v824_v5 = vadd.f32 %v1489_v35, %v677_v1 }
  0xda   :  { %v1231_v6 = vpop.f32.mrf.mxu0  ;;  %v1263_v7 = vpop.f32.mrf.mxu1 }
  0xdb   :  { %1053 = vst [vmem:[%s1750_s3 + $0x30] sm:$0xff] %v989_v2  ;;  %1085 = vst [vmem:[%s1750_s3 + $0x130] sm:$0xff] %v1021_v3  ;;  %v987_v8 = vmax.f32 %v792_v4, 0.0  ;;  %v1019_v9 = vmax.f32 %v824_v5, 0.0  ;;  %v795_v10 = vadd.f32 %v1231_v6, %v1489_v35  ;;  %v827_v11 = vadd.f32 %v1263_v7, %v1489_v35 }
  0xdc   :  { %v552_v12 = vpop.f32.mrf.mxu0  ;;  %v680_v13 = vpop.f32.mrf.mxu1 }
  0xdd   :  { %1051 = vst [vmem:[%s1750_s3 + $0x20] sm:$0xff] %v987_v8  ;;  %1083 = vst [vmem:[%s1750_s3 + $0x120] sm:$0xff] %v1019_v9  ;;  %v990_v14 = vmax.f32 %v795_v10, 0.0  ;;  %v1022_v15 = vmax.f32 %v827_v11, 0.0  ;;  %v793_v16 = vadd.f32 %v1489_v35, %v552_v12  ;;  %v825_v17 = vadd.f32 %v1489_v35, %v680_v13 }
  0xde   :  { %v1234_v18 = vpop.f32.mrf.mxu0  ;;  %v1266_v19 = vpop.f32.mrf.mxu1 }
  0xdf   :  { %1054 = vst [vmem:[%s1750_s3 + $0x38] sm:$0xff] %v990_v14  ;;  %1086 = vst [vmem:[%s1750_s3 + $0x138] sm:$0xff] %v1022_v15  ;;  %v988_v20 = vmax.f32 %v793_v16, 0.0  ;;  %v1020_v21 = vmax.f32 %v825_v17, 0.0  ;;  %v798_v22 = vadd.f32 %v1234_v18, %v1489_v35  ;;  %v830_v23 = vadd.f32 %v1266_v19, %v1489_v35 }
  0xe0   :  { %v565_v24 = vpop.f32.mrf.mxu0  ;;  %v693_v25 = vpop.f32.mrf.mxu1 }
  0xe1   :  { %1052 = vst [vmem:[%s1750_s3 + $0x28] sm:$0xff] %v988_v20  ;;  %1084 = vst [vmem:[%s1750_s3 + $0x128] sm:$0xff] %v1020_v21  ;;  %v993_v26 = vmax.f32 %v798_v22, 0.0  ;;  %v1025_v27 = vmax.f32 %v830_v23, 0.0  ;;  %v796_v28 = vadd.f32 %v1489_v35, %v565_v24  ;;  %v828_v29 = vadd.f32 %v1489_v35, %v693_v25 }
  0xe2   :  { %v1235_v30 = vpop.f32.mrf.mxu0  ;;  %v1267_v31 = vpop.f32.mrf.mxu1 }
  0xe3   :  { %1057 = vst [vmem:[%s1750_s3 + $0x50] sm:$0xff] %v993_v26  ;;  %1089 = vst [vmem:[%s1750_s3 + $0x150] sm:$0xff] %v1025_v27  ;;  %v991_v32 = vmax.f32 %v796_v28, 0.0  ;;  %v1023_v33 = vmax.f32 %v828_v29, 0.0  ;;  %v799_v34 = vadd.f32 %v1235_v30, %v1489_v35  ;;  %v831_v36 = vadd.f32 %v1267_v31, %v1489_v35 }
  0xe4   :  { %v568_v37 = vpop.f32.mrf.mxu0  ;;  %v696_v38 = vpop.f32.mrf.mxu1 }
  0xe5   :  { %1055 = vst [vmem:[%s1750_s3 + $0x40] sm:$0xff] %v991_v32  ;;  %1087 = vst [vmem:[%s1750_s3 + $0x140] sm:$0xff] %v1023_v33  ;;  %v994_v39 = vmax.f32 %v799_v34, 0.0  ;;  %v1026_v40 = vmax.f32 %v831_v36, 0.0  ;;  %v797_v41 = vadd.f32 %v1489_v35, %v568_v37  ;;  %v829_v42 = vadd.f32 %v1489_v35, %v696_v38 }
  0xe6   :  { %v1238_v43 = vpop.f32.mrf.mxu0  ;;  %v1270_v44 = vpop.f32.mrf.mxu1 }
  0xe7   :  { %1058 = vst [vmem:[%s1750_s3 + $0x58] sm:$0xff] %v994_v39  ;;  %1090 = vst [vmem:[%s1750_s3 + $0x158] sm:$0xff] %v1026_v40  ;;  %v992_v45 = vmax.f32 %v797_v41, 0.0  ;;  %v1024_v46 = vmax.f32 %v829_v42, 0.0  ;;  %v802_v47 = vadd.f32 %v1238_v43, %v1489_v35  ;;  %v834_v48 = vadd.f32 %v1270_v44, %v1489_v35 }
  0xe8   :  { %v581_v49 = vpop.f32.mrf.mxu0  ;;  %v709_v50 = vpop.f32.mrf.mxu1 }
  0xe9   :  { %1056 = vst [vmem:[%s1750_s3 + $0x48] sm:$0xff] %v992_v45  ;;  %1088 = vst [vmem:[%s1750_s3 + $0x148] sm:$0xff] %v1024_v46  ;;  %v997_v51 = vmax.f32 %v802_v47, 0.0  ;;  %v1029_v52 = vmax.f32 %v834_v48, 0.0  ;;  %v800_v53 = vadd.f32 %v1489_v35, %v581_v49  ;;  %v832_v54 = vadd.f32 %v1489_v35, %v709_v50 }
  0xea   :  { %v1239_v55 = vpop.f32.mrf.mxu0  ;;  %v1271_v56 = vpop.f32.mrf.mxu1 }
  0xeb   :  { %1061 = vst [vmem:[%s1750_s3 + $0x70] sm:$0xff] %v997_v51  ;;  %1093 = vst [vmem:[%s1750_s3 + $0x170] sm:$0xff] %v1029_v52  ;;  %v995_v57 = vmax.f32 %v800_v53, 0.0  ;;  %v1027_v58 = vmax.f32 %v832_v54, 0.0  ;;  %v803_v59 = vadd.f32 %v1239_v55, %v1489_v35  ;;  %v835_v60 = vadd.f32 %v1271_v56, %v1489_v35 }
  0xec   :  { %v584_v61 = vpop.f32.mrf.mxu0  ;;  %v712_v62 = vpop.f32.mrf.mxu1 }
  0xed   :  { %1059 = vst [vmem:[%s1750_s3 + $0x60] sm:$0xff] %v995_v57  ;;  %1091 = vst [vmem:[%s1750_s3 + $0x160] sm:$0xff] %v1027_v58  ;;  %v998_v63 = vmax.f32 %v803_v59, 0.0  ;;  %v1030_v0 = vmax.f32 %v835_v60, 0.0  ;;  %v801_v1 = vadd.f32 %v1489_v35, %v584_v61  ;;  %v833_v2 = vadd.f32 %v1489_v35, %v712_v62 }
  0xee   :  { %v1242_v3 = vpop.f32.mrf.mxu0  ;;  %v1274_v4 = vpop.f32.mrf.mxu1 }
  0xef   :  { %1062 = vst [vmem:[%s1750_s3 + $0x78] sm:$0xff] %v998_v63  ;;  %1094 = vst [vmem:[%s1750_s3 + $0x178] sm:$0xff] %v1030_v0  ;;  %v996_v5 = vmax.f32 %v801_v1, 0.0  ;;  %v1028_v6 = vmax.f32 %v833_v2, 0.0  ;;  %v806_v7 = vadd.f32 %v1242_v3, %v1489_v35  ;;  %v838_v8 = vadd.f32 %v1274_v4, %v1489_v35 }
  0xf0   :  { %v597_v9 = vpop.f32.mrf.mxu0  ;;  %v725_v10 = vpop.f32.mrf.mxu1 }
  0xf1   :  { %1060 = vst [vmem:[%s1750_s3 + $0x68] sm:$0xff] %v996_v5  ;;  %1092 = vst [vmem:[%s1750_s3 + $0x168] sm:$0xff] %v1028_v6  ;;  %v1001_v11 = vmax.f32 %v806_v7, 0.0  ;;  %v1033_v12 = vmax.f32 %v838_v8, 0.0  ;;  %v804_v13 = vadd.f32 %v1489_v35, %v597_v9  ;;  %v836_v14 = vadd.f32 %v1489_v35, %v725_v10 }
  0xf2   :  { %v1243_v15 = vpop.f32.mrf.mxu0  ;;  %v1275_v16 = vpop.f32.mrf.mxu1 }
  0xf3   :  { %1065 = vst [vmem:[%s1750_s3 + $0x90] sm:$0xff] %v1001_v11  ;;  %1097 = vst [vmem:[%s1750_s3 + $0x190] sm:$0xff] %v1033_v12  ;;  %v999_v17 = vmax.f32 %v804_v13, 0.0  ;;  %v1031_v18 = vmax.f32 %v836_v14, 0.0  ;;  %v807_v19 = vadd.f32 %v1243_v15, %v1489_v35  ;;  %v839_v20 = vadd.f32 %v1275_v16, %v1489_v35 }
  0xf4   :  { %v600_v21 = vpop.f32.mrf.mxu0  ;;  %v728_v22 = vpop.f32.mrf.mxu1 }
  0xf5   :  { %1063 = vst [vmem:[%s1750_s3 + $0x80] sm:$0xff] %v999_v17  ;;  %1095 = vst [vmem:[%s1750_s3 + $0x180] sm:$0xff] %v1031_v18  ;;  %v1002_v23 = vmax.f32 %v807_v19, 0.0  ;;  %v1034_v24 = vmax.f32 %v839_v20, 0.0  ;;  %v805_v25 = vadd.f32 %v1489_v35, %v600_v21  ;;  %v837_v26 = vadd.f32 %v1489_v35, %v728_v22 }
  0xf6   :  { %v1246_v27 = vpop.f32.mrf.mxu0  ;;  %v1278_v28 = vpop.f32.mrf.mxu1 }
  0xf7   :  { %1066 = vst [vmem:[%s1750_s3 + $0x98] sm:$0xff] %v1002_v23  ;;  %1098 = vst [vmem:[%s1750_s3 + $0x198] sm:$0xff] %v1034_v24  ;;  %v1000_v29 = vmax.f32 %v805_v25, 0.0  ;;  %v1032_v30 = vmax.f32 %v837_v26, 0.0  ;;  %v810_v31 = vadd.f32 %v1246_v27, %v1489_v35  ;;  %v842_v32 = vadd.f32 %v1278_v28, %v1489_v35 }
  0xf8   :  { %v613_v33 = vpop.f32.mrf.mxu0  ;;  %v741_v34 = vpop.f32.mrf.mxu1 }
  0xf9   :  { %1064 = vst [vmem:[%s1750_s3 + $0x88] sm:$0xff] %v1000_v29  ;;  %1096 = vst [vmem:[%s1750_s3 + $0x188] sm:$0xff] %v1032_v30  ;;  %v1005_v36 = vmax.f32 %v810_v31, 0.0  ;;  %v1037_v37 = vmax.f32 %v842_v32, 0.0  ;;  %v808_v38 = vadd.f32 %v1489_v35, %v613_v33  ;;  %v840_v39 = vadd.f32 %v1489_v35, %v741_v34 }
  0xfa   :  { %v1247_v40 = vpop.f32.mrf.mxu0  ;;  %v1279_v41 = vpop.f32.mrf.mxu1 }
  0xfb   :  { %1069 = vst [vmem:[%s1750_s3 + $0xb0] sm:$0xff] %v1005_v36  ;;  %1101 = vst [vmem:[%s1750_s3 + $0x1b0] sm:$0xff] %v1037_v37  ;;  %v1003_v42 = vmax.f32 %v808_v38, 0.0  ;;  %v1035_v43 = vmax.f32 %v840_v39, 0.0  ;;  %v811_v44 = vadd.f32 %v1247_v40, %v1489_v35  ;;  %v843_v45 = vadd.f32 %v1279_v41, %v1489_v35 }
  0xfc   :  { %v616_v46 = vpop.f32.mrf.mxu0  ;;  %v744_v47 = vpop.f32.mrf.mxu1 }
  0xfd   :  { %1067 = vst [vmem:[%s1750_s3 + $0xa0] sm:$0xff] %v1003_v42  ;;  %1099 = vst [vmem:[%s1750_s3 + $0x1a0] sm:$0xff] %v1035_v43  ;;  %v1006_v48 = vmax.f32 %v811_v44, 0.0  ;;  %v1038_v49 = vmax.f32 %v843_v45, 0.0  ;;  %v809_v50 = vadd.f32 %v1489_v35, %v616_v46  ;;  %v841_v51 = vadd.f32 %v1489_v35, %v744_v47 }
  0xfe   :  { %v1250_v52 = vpop.f32.mrf.mxu0  ;;  %v1282_v53 = vpop.f32.mrf.mxu1 }
  0xff   :  { %1070 = vst [vmem:[%s1750_s3 + $0xb8] sm:$0xff] %v1006_v48  ;;  %1102 = vst [vmem:[%s1750_s3 + $0x1b8] sm:$0xff] %v1038_v49  ;;  %v1004_v54 = vmax.f32 %v809_v50, 0.0  ;;  %v1036_v55 = vmax.f32 %v841_v51, 0.0  ;;  %v814_v56 = vadd.f32 %v1250_v52, %v1489_v35  ;;  %v846_v57 = vadd.f32 %v1282_v53, %v1489_v35 }
 0x100   :  { %v629_v58 = vpop.f32.mrf.mxu0  ;;  %v757_v59 = vpop.f32.mrf.mxu1 }
 0x101   :  { %1068 = vst [vmem:[%s1750_s3 + $0xa8] sm:$0xff] %v1004_v54  ;;  %1100 = vst [vmem:[%s1750_s3 + $0x1a8] sm:$0xff] %v1036_v55  ;;  %v1009_v60 = vmax.f32 %v814_v56, 0.0  ;;  %v1041_v61 = vmax.f32 %v846_v57, 0.0  ;;  %v812_v62 = vadd.f32 %v1489_v35, %v629_v58  ;;  %v844_v63 = vadd.f32 %v1489_v35, %v757_v59 }
 0x102   :  { %v1251_v0 = vpop.f32.mrf.mxu0  ;;  %v1283_v1 = vpop.f32.mrf.mxu1 }
 0x103   :  { %1073 = vst [vmem:[%s1750_s3 + $0xd0] sm:$0xff] %v1009_v60  ;;  %1105 = vst [vmem:[%s1750_s3 + $0x1d0] sm:$0xff] %v1041_v61  ;;  %v1007_v2 = vmax.f32 %v812_v62, 0.0  ;;  %v1039_v3 = vmax.f32 %v844_v63, 0.0  ;;  %v815_v4 = vadd.f32 %v1251_v0, %v1489_v35  ;;  %v847_v5 = vadd.f32 %v1283_v1, %v1489_v35 }
 0x104   :  { %v632_v6 = vpop.f32.mrf.mxu0  ;;  %v760_v7 = vpop.f32.mrf.mxu1 }
 0x105   :  { %1071 = vst [vmem:[%s1750_s3 + $0xc0] sm:$0xff] %v1007_v2  ;;  %1103 = vst [vmem:[%s1750_s3 + $0x1c0] sm:$0xff] %v1039_v3  ;;  %v1010_v8 = vmax.f32 %v815_v4, 0.0  ;;  %v1042_v9 = vmax.f32 %v847_v5, 0.0  ;;  %v813_v10 = vadd.f32 %v1489_v35, %v632_v6  ;;  %v845_v11 = vadd.f32 %v1489_v35, %v760_v7 }
 0x106   :  { %v1254_v12 = vpop.f32.mrf.mxu0  ;;  %v1286_v13 = vpop.f32.mrf.mxu1 }
 0x107   :  { %1074 = vst [vmem:[%s1750_s3 + $0xd8] sm:$0xff] %v1010_v8  ;;  %1106 = vst [vmem:[%s1750_s3 + $0x1d8] sm:$0xff] %v1042_v9  ;;  %v1008_v14 = vmax.f32 %v813_v10, 0.0  ;;  %v1040_v15 = vmax.f32 %v845_v11, 0.0  ;;  %v818_v16 = vadd.f32 %v1254_v12, %v1489_v35  ;;  %v850_v17 = vadd.f32 %v1286_v13, %v1489_v35 }
 0x108   :  { %v645_v18 = vpop.f32.mrf.mxu0  ;;  %v773_v19 = vpop.f32.mrf.mxu1 }
 0x109   :  { %1072 = vst [vmem:[%s1750_s3 + $0xc8] sm:$0xff] %v1008_v14  ;;  %1104 = vst [vmem:[%s1750_s3 + $0x1c8] sm:$0xff] %v1040_v15  ;;  %v1013_v20 = vmax.f32 %v818_v16, 0.0  ;;  %v1045_v21 = vmax.f32 %v850_v17, 0.0  ;;  %v816_v22 = vadd.f32 %v1489_v35, %v645_v18  ;;  %v848_v23 = vadd.f32 %v1489_v35, %v773_v19 }
 0x10a   :  { %v1255_v24 = vpop.f32.mrf.mxu0  ;;  %v1287_v25 = vpop.f32.mrf.mxu1 }
 0x10b   :  { %1077 = vst [vmem:[%s1750_s3 + $0xf0] sm:$0xff] %v1013_v20  ;;  %1109 = vst [vmem:[%s1750_s3 + $0x1f0] sm:$0xff] %v1045_v21  ;;  %v1011_v26 = vmax.f32 %v816_v22, 0.0  ;;  %v1043_v27 = vmax.f32 %v848_v23, 0.0  ;;  %v819_v28 = vadd.f32 %v1255_v24, %v1489_v35  ;;  %v851_v29 = vadd.f32 %v1287_v25, %v1489_v35 }
 0x10c   :  { %v648_v30 = vpop.f32.mrf.mxu0  ;;  %v776_v31 = vpop.f32.mrf.mxu1 }
 0x10d   :  { %1075 = vst [vmem:[%s1750_s3 + $0xe0] sm:$0xff] %v1011_v26  ;;  %1107 = vst [vmem:[%s1750_s3 + $0x1e0] sm:$0xff] %v1043_v27  ;;  %v1014_v32 = vmax.f32 %v819_v28, 0.0  ;;  %v1046_v33 = vmax.f32 %v851_v29, 0.0  ;;  %v817_v34 = vadd.f32 %v1489_v35, %v648_v30  ;;  %v849_v36 = vadd.f32 %v1489_v35, %v776_v31 }
 0x10f   :  { %1078 = vst [vmem:[%s1750_s3 + $0xf8] sm:$0xff] %v1014_v32  ;;  %1110 = vst [vmem:[%s1750_s3 + $0x1f8] sm:$0xff] %v1046_v33  ;;  %v1012_v37 = vmax.f32 %v817_v34, 0.0  ;;  %v1044_v38 = vmax.f32 %v849_v36, 0.0 }
 0x111   :  { %1076 = vst [vmem:[%s1750_s3 + $0xe8] sm:$0xff] %v1012_v37  ;;  %1108 = vst [vmem:[%s1750_s3 + $0x1e8] sm:$0xff] %v1044_v38 }

</bundles_post_ra>
